<compile_context>
chip_gen: v6e
topology: v6e:2x2x1
jax: 0.10.0
libtpu: 0.0.40
codegen_flags: <defaults>
</compile_context>

<pallas_src>
import jax
import jax.numpy as jnp
from jax.experimental import pallas as pl
from jax.experimental.pallas import tpu as pltpu

H1 = 64       # hidden width of layer 1 (PyTorch)
H2 = 128      # hidden width of layer 2
HPAD = 128    # layer-1 hidden width padded to a full lane width
MIN_TB = 128  # batch-tile quantum (keeps all blocks (8,128)/(16,128) legal)


def _round_up(x, m):
    return ((x + m - 1) // m) * m


def _pick_tile(batch, block_b):
    """Batch tile: multiple of 128, <= max(batch,128), >=2 grid steps when possible."""
    block_b = max(MIN_TB, _round_up(block_b, MIN_TB))
    b_ceil = _round_up(max(batch, 1), MIN_TB)
    if b_ceil >= 2 * MIN_TB:
        # Cap so the grid has at least 2 steps -> both v7x TensorCores get work.
        return min(block_b, _round_up(b_ceil // 2, MIN_TB))
    return MIN_TB


def reward_mlp_kernel(z_ref, a_ref, w1z_ref, w1a_ref, b1_ref,
                      w2_ref, b2_ref, w3_ref, b3_ref, out_ref):
    # Layer 1: split matmul replaces the input concat; f32 accumulation on MXU.
    h1 = (jnp.dot(z_ref[...], w1z_ref[...], preferred_element_type=jnp.float32)
          + jnp.dot(a_ref[...], w1a_ref[...], preferred_element_type=jnp.float32)
          + b1_ref[...])
    h1 = jnp.maximum(h1, 0.0)

    # Layer 2 (K padded 64->128, MXU-aligned).  Cast back to the weight dtype
    # so the bf16 path keeps the MXU on native bf16 inputs; accumulate in f32.
    h2 = jnp.dot(h1.astype(w2_ref.dtype), w2_ref[...],
                 preferred_element_type=jnp.float32) + b2_ref[...]
    h2 = jnp.maximum(h2, 0.0)

    # Layer 3 (N=1) computed transposed so the result is a lane-dense [1, TB]
    # row: contract w3 [8, H2] (row 0 real, rows 1..7 zero) with h2 [TB, H2]
    # over their last dims (same trans-B dimension numbers as q @ k.T).
    y = jax.lax.dot_general(w3_ref[...], h2, (((1,), (1,)), ((), ())),
                            preferred_element_type=jnp.float32)     # [8, TB]
    out_ref[...] = (y[0:1, :] + b3_ref[0]).astype(out_ref.dtype)


def prepare_params(params, latent_dim, compute_dtype=jnp.bfloat16):
    """One-time parameter massaging (hoisted out of the forward path).

    Weights are stored [in, out] (transposed vs. PyTorch's [out, in])."""
    w1, b1, w2, b2, w3, b3 = params
    pad1 = HPAD - w1.shape[1]
    w1_z = jnp.pad(w1[:latent_dim], ((0, 0), (0, pad1))).astype(compute_dtype)
    w1_a = jnp.pad(w1[latent_dim:], ((0, 0), (0, pad1))).astype(compute_dtype)
    b1_p = jnp.pad(b1, (0, pad1)).reshape(1, HPAD).astype(jnp.float32)
    w2_p = jnp.pad(w2, ((0, pad1), (0, 0))).astype(compute_dtype)
    b2_r = b2.reshape(1, H2).astype(jnp.float32)
    # Layer-3 weight staged as an [8, H2] MXU operand (row 0 = w3, rest zero)
    # so the transposed dot yields the lane-dense [1, TB] row.  Kept in f32
    # for final-output accuracy (cost is negligible).
    w3_m = jnp.zeros((8, H2), jnp.float32).at[0].set(w3.reshape(H2).astype(jnp.float32))
    b3_s = b3.reshape(1).astype(jnp.float32)
    return (w1_z, w1_a, b1_p, w2_p, b2_r, w3_m, b3_s)


def reward_nn_forward(latent_z, action, prepared, *, block_b=4096):
    """latent_z: [B, L], action: [B, A] -> reward: [B, 1] (float32)."""
    w1_z, w1_a, b1_p, w2_p, b2_r, w3_m, b3_s = prepared
    B, L = latent_z.shape
    A = action.shape[-1]
    assert w1_z.shape[0] == L and w1_a.shape[0] == A

    # Matmul-operand dtype comes from the prepared weights (default bf16).
    # In a full TD-MPC pipeline this cast fuses into the producing encoder op;
    # it halves the bytes the kernel streams from HBM.
    compute_dtype = w1_z.dtype
    latent_z = latent_z.astype(compute_dtype)
    action = action.astype(compute_dtype)

    tb = _pick_tile(B, block_b)
    if B < tb:
        # Only possible for B < 128 — padding a handful of rows is negligible.
        latent_z = jnp.pad(latent_z, ((0, tb - B), (0, 0)))
        action = jnp.pad(action, ((0, tb - B), (0, 0)))
        rows = tb
    else:
        # Ragged tail handled by Pallas partial final blocks (rows are
        # independent; out-of-range columns are never written back).
        rows = B
    grid = (pl.cdiv(rows, tb),)

    # Scoped-VMEM budget: double-buffered z/a tiles (last dim lane-padded to
    # 128), double-buffered (1, tb) out row (padded to 8 sublanes), f32
    # h1/h2/layer-3 temporaries, weights + headroom.  Clamped to 48 MiB so it
    # stays inside v7x's 64 MiB physical VMEM.
    in_item = jnp.dtype(compute_dtype).itemsize
    vmem_needed = (2 * 2 * tb * 128 * in_item
                   + 2 * 8 * tb * 4
                   + 4 * tb * 128 * 4
                   + (2 << 20))
    vmem_limit = int(min(max(vmem_needed, 32 << 20), 48 << 20))

    bytes_in = (latent_z.size * latent_z.dtype.itemsize
                + action.size * action.dtype.itemsize)
    cost = pl.CostEstimate(
        flops=2 * rows * (L * HPAD + A * HPAD + HPAD * H2 + 8 * H2),
        transcendentals=0,
        bytes_accessed=int(bytes_in + rows * 4),
    )

    out = pl.pallas_call(
        reward_mlp_kernel,
        out_shape=jax.ShapeDtypeStruct((1, rows), jnp.float32),
        grid=grid,
        in_specs=[
            pl.BlockSpec((tb, L), lambda i: (i, 0)),      # latent_z tile (pipelined)
            pl.BlockSpec((tb, A), lambda i: (i, 0)),      # action tile (pipelined)
            pl.BlockSpec(w1_z.shape, lambda i: (0, 0)),   # weights/biases: VMEM-resident
            pl.BlockSpec(w1_a.shape, lambda i: (0, 0)),
            pl.BlockSpec(b1_p.shape, lambda i: (0, 0)),
            pl.BlockSpec(w2_p.shape, lambda i: (0, 0)),
            pl.BlockSpec(b2_r.shape, lambda i: (0, 0)),
            pl.BlockSpec(w3_m.shape, lambda i: (0, 0)),
            pl.BlockSpec(memory_space=pltpu.MemorySpace.SMEM),  # b3 scalar
        ],
        out_specs=pl.BlockSpec((1, tb), lambda i: (0, i)),       # lane-dense row
        compiler_params=pltpu.CompilerParams(
            dimension_semantics=("parallel",),
            vmem_limit_bytes=vmem_limit),
        cost_estimate=cost,
    )(latent_z, action, w1_z, w1_a, b1_p, w2_p, b2_r, w3_m, b3_s)

    return out[0, :B].reshape(B, 1)


def init_params(key, latent_dim, action_dim):
    """Deterministic init mirroring nn.Linear default (uniform(+-1/sqrt(fan_in))).
    Weights stored [in, out] (transposed vs. PyTorch's [out, in])."""
    dims = [(latent_dim + action_dim, H1), (H1, H2), (H2, 1)]
    params = []
    for i, (fan_in, fan_out) in enumerate(dims):
        kw, kb = jax.random.split(jax.random.fold_in(key, i))
        bound = 1.0 / jnp.sqrt(jnp.float32(fan_in))
        w = jax.random.uniform(kw, (fan_in, fan_out), jnp.float32, -bound, bound)
        b = jax.random.uniform(kb, (fan_out,), jnp.float32, -bound, bound)
        params += [w, b]
    return tuple(params)


def reward_nn_ref(latent_z, action, params):
    """Pure-JAX reference (highest-precision matmuls) for correctness checks."""
    w1, b1, w2, b2, w3, b3 = params
    hp = jax.lax.Precision.HIGHEST
    x = jnp.concatenate([latent_z, action], axis=-1)
    h1 = jnp.maximum(jnp.dot(x, w1, precision=hp) + b1, 0.0)
    h2 = jnp.maximum(jnp.dot(h1, w2, precision=hp) + b2, 0.0)
    return jnp.dot(h2, w3, precision=hp) + b3


if __name__ == "__main__":
    key = jax.random.PRNGKey(0)
    latent_dim, action_dim, batch = 24, 8, 8

    k_p, k_z, k_a = jax.random.split(key, 3)
    params = init_params(k_p, latent_dim, action_dim)
    prepared_bf16 = prepare_params(params, latent_dim)                         # default bf16
    prepared_f32 = prepare_params(params, latent_dim, compute_dtype=jnp.float32)

    latent_z = jax.random.normal(k_z, (batch, latent_dim), jnp.float32)
    action = jax.random.normal(k_a, (batch, action_dim), jnp.float32)
    ref = reward_nn_ref(latent_z, action, params)

    # 1) Small batch, f32 operands -> tight check of the kernel math.
    out_f32 = reward_nn_forward(latent_z, action, prepared_f32)
    jax.block_until_ready(out_f32)
    assert out_f32.shape == (batch, 1)
    assert jnp.allclose(out_f32, ref, atol=5e-3, rtol=5e-3)

    # 2) Small batch, default bf16 operands -> expected small precision loss.
    out_bf16 = reward_nn_forward(latent_z, action, prepared_bf16)
    jax.block_until_ready(out_bf16)
    assert out_bf16.shape == (batch, 1)
    assert jnp.allclose(out_bf16, ref, atol=5e-2, rtol=5e-2)

    # 3) Ragged batch, multi-step grid (tb=256, 2 steps, partial final block),
    #    no input padding, f32 operands.
    B2 = 300
    k_z2, k_a2 = jax.random.split(jax.random.fold_in(key, 7))
    z2 = jax.random.normal(k_z2, (B2, latent_dim), jnp.float32)
    a2 = jax.random.normal(k_a2, (B2, action_dim), jnp.float32)
    ref2 = reward_nn_ref(z2, a2, params)

    out2_f32 = reward_nn_forward(z2, a2, prepared_f32)
    jax.block_until_ready(out2_f32)
    assert out2_f32.shape == (B2, 1)
    assert jnp.allclose(out2_f32, ref2, atol=5e-3, rtol=5e-3)

    # 4) Same ragged batch, small block_b (3-step grid), default bf16 operands.
    out2_bf16 = reward_nn_forward(z2, a2, prepared_bf16, block_b=128)
    jax.block_until_ready(out2_bf16)
    assert out2_bf16.shape == (B2, 1)
    assert jnp.allclose(out2_bf16, ref2, atol=5e-2, rtol=5e-2)

    print("KERNEL_OK")
</pallas_src>

<mosaic_0001>
module attributes {stable_mosaic.version = 11 : i64} {
  func.func @reward_mlp_kernel(%arg0: i32, %arg1: memref<128x24xf32, #tpu.memory_space<vmem>>, %arg2: memref<128x8xf32, #tpu.memory_space<vmem>>, %arg3: memref<24x128xf32, #tpu.memory_space<vmem>>, %arg4: memref<8x128xf32, #tpu.memory_space<vmem>>, %arg5: memref<1x128xf32, #tpu.memory_space<vmem>>, %arg6: memref<128x128xf32, #tpu.memory_space<vmem>>, %arg7: memref<1x128xf32, #tpu.memory_space<vmem>>, %arg8: memref<8x128xf32, #tpu.memory_space<vmem>>, %arg9: memref<1xf32, #tpu.memory_space<smem>>, %arg10: memref<1x128xf32, #tpu.memory_space<vmem>>) attributes {dimension_semantics = [#tpu.dimension_semantics<parallel>], iteration_bounds = array<i64: 1>, scalar_prefetch = 0 : i64, scratch_operands = 0 : i64, tpu.core_type = #tpu.core_type<tc>, window_params = [{transform_indices = @transform_0, window_bounds = array<i64: 128, 24>}, {transform_indices = @transform_1, window_bounds = array<i64: 128, 8>}, {pipeline_mode = #tpu.pipeline_mode<synchronous>, transform_indices = @transform_2, window_bounds = array<i64: 24, 128>}, {pipeline_mode = #tpu.pipeline_mode<synchronous>, transform_indices = @transform_3, window_bounds = array<i64: 8, 128>}, {pipeline_mode = #tpu.pipeline_mode<synchronous>, transform_indices = @transform_4, window_bounds = array<i64: 1, 128>}, {pipeline_mode = #tpu.pipeline_mode<synchronous>, transform_indices = @transform_5, window_bounds = array<i64: 128, 128>}, {pipeline_mode = #tpu.pipeline_mode<synchronous>, transform_indices = @transform_6, window_bounds = array<i64: 1, 128>}, {pipeline_mode = #tpu.pipeline_mode<synchronous>, transform_indices = @transform_7, window_bounds = array<i64: 8, 128>}, {transform_indices = @transform_8, window_bounds = array<i64: 1>}, {transform_indices = @transform_9, window_bounds = array<i64: 1, 128>}]} {
    %c0 = arith.constant 0 : index
    %c0_0 = arith.constant 0 : index
    %0 = vector.load %arg1[%c0, %c0_0] : memref<128x24xf32, #tpu.memory_space<vmem>>, vector<128x24xf32>
    %c0_1 = arith.constant 0 : index
    %c0_2 = arith.constant 0 : index
    %1 = vector.load %arg3[%c0_1, %c0_2] : memref<24x128xf32, #tpu.memory_space<vmem>>, vector<24x128xf32>
    %cst = arith.constant dense<0.000000e+00> : vector<128x128xf32>
    %2 = tpu.matmul %0, %1, %cst {dimension_numbers = #tpu.dot_dimension_numbers<[1], [0], [0], [1], [0, 0, 1, 1], [], []>} : vector<128x24xf32>, vector<24x128xf32>, vector<128x128xf32> -> vector<128x128xf32>
    %c0_3 = arith.constant 0 : index
    %c0_4 = arith.constant 0 : index
    %3 = vector.load %arg2[%c0_3, %c0_4] : memref<128x8xf32, #tpu.memory_space<vmem>>, vector<128x8xf32>
    %c0_5 = arith.constant 0 : index
    %c0_6 = arith.constant 0 : index
    %4 = vector.load %arg4[%c0_5, %c0_6] : memref<8x128xf32, #tpu.memory_space<vmem>>, vector<8x128xf32>
    %cst_7 = arith.constant dense<0.000000e+00> : vector<128x128xf32>
    %5 = tpu.matmul %3, %4, %cst_7 {dimension_numbers = #tpu.dot_dimension_numbers<[1], [0], [0], [1], [0, 0, 1, 1], [], []>} : vector<128x8xf32>, vector<8x128xf32>, vector<128x128xf32> -> vector<128x128xf32>
    %6 = arith.addf %2, %5 : vector<128x128xf32>
    %c0_8 = arith.constant 0 : index
    %c0_9 = arith.constant 0 : index
    %7 = vector.load %arg5[%c0_8, %c0_9] : memref<1x128xf32, #tpu.memory_space<vmem>>, vector<1x128xf32>
    %8 = vector.broadcast %7 : vector<1x128xf32> to vector<128x128xf32>
    %9 = arith.addf %6, %8 : vector<128x128xf32>
    %cst_10 = arith.constant 0.000000e+00 : f32
    %10 = vector.broadcast %cst_10 : f32 to vector<128x128xf32>
    %11 = arith.maximumf %9, %10 : vector<128x128xf32>
    %c0_11 = arith.constant 0 : index
    %c0_12 = arith.constant 0 : index
    %12 = vector.load %arg6[%c0_11, %c0_12] : memref<128x128xf32, #tpu.memory_space<vmem>>, vector<128x128xf32>
    %cst_13 = arith.constant dense<0.000000e+00> : vector<128x128xf32>
    %13 = tpu.matmul %11, %12, %cst_13 {dimension_numbers = #tpu.dot_dimension_numbers<[1], [0], [0], [1], [0, 0, 1, 1], [], []>} : vector<128x128xf32>, vector<128x128xf32>, vector<128x128xf32> -> vector<128x128xf32>
    %c0_14 = arith.constant 0 : index
    %c0_15 = arith.constant 0 : index
    %14 = vector.load %arg7[%c0_14, %c0_15] : memref<1x128xf32, #tpu.memory_space<vmem>>, vector<1x128xf32>
    %15 = vector.broadcast %14 : vector<1x128xf32> to vector<128x128xf32>
    %16 = arith.addf %13, %15 : vector<128x128xf32>
    %cst_16 = arith.constant 0.000000e+00 : f32
    %17 = vector.broadcast %cst_16 : f32 to vector<128x128xf32>
    %18 = arith.maximumf %16, %17 : vector<128x128xf32>
    %c0_17 = arith.constant 0 : index
    %c0_18 = arith.constant 0 : index
    %19 = vector.load %arg8[%c0_17, %c0_18] : memref<8x128xf32, #tpu.memory_space<vmem>>, vector<8x128xf32>
    %cst_19 = arith.constant dense<0.000000e+00> : vector<8x128xf32>
    %20 = tpu.matmul %19, %18, %cst_19 {dimension_numbers = #tpu.dot_dimension_numbers<[1], [1], [0], [0], [0, 0, 1, 0], [], []>} : vector<8x128xf32>, vector<128x128xf32>, vector<8x128xf32> -> vector<8x128xf32>
    %21 = vector.extract_strided_slice %20 {offsets = [0, 0], sizes = [1, 128], strides = [1, 1]} : vector<8x128xf32> to vector<1x128xf32>
    %c0_20 = arith.constant 0 : index
    %22 = memref.load %arg9[%c0_20] : memref<1xf32, #tpu.memory_space<smem>>
    %23 = vector.broadcast %22 : f32 to vector<1x128xf32>
    %24 = arith.addf %21, %23 : vector<1x128xf32>
    %c0_21 = arith.constant 0 : index
    %c0_22 = arith.constant 0 : index
    %25 = vector.load %arg10[%c0_21, %c0_22] : memref<1x128xf32, #tpu.memory_space<vmem>>, vector<1x128xf32>
    tpu.vector_store %arg10[%c0_21, %c0_22], %24 {strides = array<i32>} : memref<1x128xf32, #tpu.memory_space<vmem>>, vector<1x128xf32>,
    return
  }
  func.func @transform_0(%arg0: i32) -> (i32, i32) {
    %c0_i32 = arith.constant 0 : i32
    %c0_i32_0 = arith.constant 0 : i32
    return %arg0, %c0_i32 : i32, i32
  }
  func.func @transform_1(%arg0: i32) -> (i32, i32) {
    %c0_i32 = arith.constant 0 : i32
    %c0_i32_0 = arith.constant 0 : i32
    return %arg0, %c0_i32 : i32, i32
  }
  func.func @transform_2(%arg0: i32) -> (i32, i32) {
    %c0_i32 = arith.constant 0 : i32
    %c0_i32_0 = arith.constant 0 : i32
    %c0_i32_1 = arith.constant 0 : i32
    return %c0_i32, %c0_i32_0 : i32, i32
  }
  func.func @transform_3(%arg0: i32) -> (i32, i32) {
    %c0_i32 = arith.constant 0 : i32
    %c0_i32_0 = arith.constant 0 : i32
    %c0_i32_1 = arith.constant 0 : i32
    return %c0_i32, %c0_i32_0 : i32, i32
  }
  func.func @transform_4(%arg0: i32) -> (i32, i32) {
    %c0_i32 = arith.constant 0 : i32
    %c0_i32_0 = arith.constant 0 : i32
    %c0_i32_1 = arith.constant 0 : i32
    return %c0_i32, %c0_i32_0 : i32, i32
  }
  func.func @transform_5(%arg0: i32) -> (i32, i32) {
    %c0_i32 = arith.constant 0 : i32
    %c0_i32_0 = arith.constant 0 : i32
    %c0_i32_1 = arith.constant 0 : i32
    return %c0_i32, %c0_i32_0 : i32, i32
  }
  func.func @transform_6(%arg0: i32) -> (i32, i32) {
    %c0_i32 = arith.constant 0 : i32
    %c0_i32_0 = arith.constant 0 : i32
    %c0_i32_1 = arith.constant 0 : i32
    return %c0_i32, %c0_i32_0 : i32, i32
  }
  func.func @transform_7(%arg0: i32) -> (i32, i32) {
    %c0_i32 = arith.constant 0 : i32
    %c0_i32_0 = arith.constant 0 : i32
    %c0_i32_1 = arith.constant 0 : i32
    return %c0_i32, %c0_i32_0 : i32, i32
  }
  func.func @transform_8(%arg0: i32) -> i32 {
    %c0_i32 = arith.constant 0 : i32
    %c0_i32_0 = arith.constant 0 : i32
    return %c0_i32 : i32
  }
  func.func @transform_9(%arg0: i32) -> (i32, i32) {
    %c0_i32 = arith.constant 0 : i32
    %c0_i32_0 = arith.constant 0 : i32
    return %c0_i32, %arg0 : i32, i32
  }
}

</mosaic_0001>

<bundles_post_ra>
// kernel: tpu_custom_call.1
= control target key start
LH: loop header
LB: loop body
LE: loop exit
PB: predicated region body
PF: predicated region fallthrough
CT: control target
= control target key end

     0   :  { %vm70_vm0 = vcmask 64512   ;;  %vm264_vm1 = vcmask 195584   ;;  %s1361_s0 = inlined_call_operand.vmem [shape: f32[128,24], index: 0, kind: input, shape index: {}]   ;;  %s1362_s1 = inlined_call_operand.vmem [shape: f32[128,8], index: 1, kind: input, shape index: {}]   ;;  %s1363_s2 = inlined_call_operand.vmem [shape: f32[24,128], index: 2, kind: input, shape index: {}]   ;;  %s1364_s3 = inlined_call_operand.vmem [shape: f32[8,128], index: 3, kind: input, shape index: {}]   ;;  %s1365_s4 = inlined_call_operand.vmem [shape: f32[1,128], index: 4, kind: input, shape index: {}]   ;;  %s1366_s5 = inlined_call_operand.vmem [shape: f32[128,128], index: 5, kind: input, shape index: {}]   ;;  %s1367_s6 = inlined_call_operand.vmem [shape: f32[1,128], index: 6, kind: input, shape index: {}]   ;;  %s1368_s7 = inlined_call_operand.vmem [shape: f32[8,128], index: 7, kind: input, shape index: {}]   ;;  %s1369_s8 = inlined_call_operand.<no memory space> [shape: f32[1], index: 8, kind: input, shape index: {}]   ;;  %s1370_s9 = inlined_call_operand.hbm [shape: f32[1,128], index: 9, kind: output, shape index: {}]  }
   0x1   :  { %v52_v0 = vld [vmem:[%s1363_s2 + $0x10] sm:$0xff]  ;;  %v69_v1 = vld [vmem:[%s1364_s3] sm:$0xff]  ;;  %v51_v2 = vld [vmem:[%s1363_s2 + $0x8] sm:$0xff] }
   0x2   :  { %915 = vmatprep.subr.mxu1 %v52_v0  ;;  %889 = vmatprep.subr.mxu0 %v69_v1  ;;  %v53_v3 = vld [vmem:[%s1362_s1] sm:$0xff]  ;;  %v54_v4 = vld [vmem:[%s1362_s1 + $0x8] sm:$0xff]  ;;  %v55_v7 = vld [vmem:[%s1362_s1 + $0x10] sm:$0xff] }
   0x3   :  { %916 = vmatpush3.msra.mxu1 %v52_v0  ;;  %890 = vmatpush3.msra.mxu0 %v69_v1  ;;  %v50_v5 = vld [vmem:[%s1363_s2] sm:$0xff]  ;;  %v35_v8 = vld [vmem:[%s1361_s0 + $0x8] sm:$0xff]  ;;  %v56_v9 = vld [vmem:[%s1362_s1 + $0x18] sm:$0xff] }
   0x4   :  { %v34_v6 = vld [vmem:[%s1361_s0] sm:$0xff]  ;;  %917 = vmatprep.subr.mxu1 %v51_v2  ;;  %891 = vmatprep.mubr.msk.f32.mxu0 %vm70_vm0, %v53_v3  ;;  %v36_v10 = vld [vmem:[%s1361_s0 + $0x10] sm:$0xff]  ;;  %v37_v12 = vld [vmem:[%s1361_s0 + $0x18] sm:$0xff] }
   0x5   :  { %918 = vmatpush3.msra.mxu1 %v51_v2  ;;  %892 = vmatmul.mubr.msk.f32.vlgmr.msra.gmra.mxu0 %vm70_vm0, %v54_v4  ;;  %v57_v11 = vld [vmem:[%s1362_s1 + $0x20] sm:$0xff]  ;;  %v58_v13 = vld [vmem:[%s1362_s1 + $0x28] sm:$0xff]  ;;  %v59_v15 = vld [vmem:[%s1362_s1 + $0x30] sm:$0xff] }
   0x6   :  { %919 = vmatprep.subr.mxu1 %v50_v5  ;;  %921 = vmatprep.mubr.msk.f32.mxu1 %vm264_vm1, %v34_v6  ;;  %v38_v14 = vld [vmem:[%s1361_s0 + $0x20] sm:$0xff]  ;;  %v39_v16 = vld [vmem:[%s1361_s0 + $0x28] sm:$0xff]  ;;  %v512_v17 = vld [vmem:[%s1366_s5 + $0x78] sm:$0xff] }
   0x7   :  { %920 = vmatpush3.msra.mxu1 %v50_v5  ;;  %894 = vmatprep.mubr.msk.f32.mxu0 %vm70_vm0, %v55_v7  ;;  %v511_v18 = vld [vmem:[%s1366_s5 + $0x70] sm:$0xff]  ;;  %v60_v19 = vld [vmem:[%s1362_s1 + $0x38] sm:$0xff]  ;;  %v61_v21 = vld [vmem:[%s1362_s1 + $0x40] sm:$0xff] }
   0x8   :  { %922 = vmatmul.mubr.msk.f32.vlgmr.msra.gmra.mxu1 %vm264_vm1, %v35_v8  ;;  %v40_v20 = vld [vmem:[%s1361_s0 + $0x30] sm:$0xff]  ;;  %945 = vmatprep.subr.mxu0 %v512_v17  ;;  %v510_v22 = vld [vmem:[%s1366_s5 + $0x68] sm:$0xff] }
   0x9   :  { %895 = vmatmul.mubr.msk.f32.gmra.mxu0 %vm70_vm0, %v56_v9  ;;  %924 = vmatprep.mubr.msk.f32.mxu1 %vm264_vm1, %v36_v10 }
   0xa   :  { %897 = vmatprep.mubr.msk.f32.mxu0 %vm70_vm0, %v57_v11  ;;  %946 = vmatpush3.msra.mxu0 %v512_v17 }
   0xb   :  { %947 = vmatprep.subr.mxu0 %v511_v18 }
   0xc   :  { %925 = vmatmul.mubr.msk.f32.gmra.mxu1 %vm264_vm1, %v37_v12 }
   0xd   :  { %898 = vmatmul.mubr.msk.f32.gmra.mxu0 %vm70_vm0, %v58_v13  ;;  %927 = vmatprep.mubr.msk.f32.mxu1 %vm264_vm1, %v38_v14 }
   0xe   :  { %900 = vmatprep.mubr.msk.f32.mxu0 %vm70_vm0, %v59_v15 }
  0x10   :  { %928 = vmatmul.mubr.msk.f32.gmra.mxu1 %vm264_vm1, %v39_v16 }
  0x11   :  { %15 = vsyncpa [#allocation4], 0  ;;  %901 = vmatmul.mubr.msk.f32.gmra.mxu0 %vm70_vm0, %v60_v19  ;;  %930 = vmatprep.mubr.msk.f32.mxu1 %vm264_vm1, %v40_v20  ;;  %v41_v23 = vld [vmem:[%s1361_s0 + $0x38] sm:$0xff]  ;;  %v62_v24 = vld [vmem:[%s1362_s1 + $0x48] sm:$0xff]  ;;  %vm1062_vm2 = vmmov 0   ;;  %s1063_s23 = smov [#allocation3]  }
  0x12   :  { %903 = vmatprep.mubr.msk.f32.mxu0 %vm70_vm0, %v61_v21  ;;  %v42_v25 = vld [vmem:[%s1361_s0 + $0x40] sm:$0xff]  ;;  %948 = vmatpush3.msra.mxu0 %v511_v18  ;;  %v63_v26 = vld [vmem:[%s1362_s1 + $0x50] sm:$0xff]  ;;  %v43_v28 = vld [vmem:[%s1361_s0 + $0x48] sm:$0xff]  ;;  %s762_s24 = sshll.u32 %s1063_s23, 4  ;;  %s763_s24 = int_to_ptr.vmem [resolvable:$true] %s762_s24 }
  0x13   :  { %949 = vmatprep.subr.mxu0 %v510_v22  ;;  %v509_v27 = vld [vmem:[%s1366_s5 + $0x60] sm:$0xff]  ;;  %v508_v29 = vld [vmem:[%s1366_s5 + $0x58] sm:$0xff]  ;;  %v44_v31 = vld [vmem:[%s1361_s0 + $0x50] sm:$0xff]  ;;  %s1039_s25 = scalar_lea.vmem %s763_s24, 16  ;;  %s1043_s2 = scalar_lea.vmem %s763_s24, 32 }
  0x14   :  { %931 = vmatmul.mubr.msk.f32.gmra.mxu1 %vm264_vm1, %v41_v23  ;;  %950 = vmatpush3.msra.mxu0 %v510_v22  ;;  %v64_v30 = vld [vmem:[%s1362_s1 + $0x58] sm:$0xff]  ;;  %v65_v32 = vld [vmem:[%s1362_s1 + $0x60] sm:$0xff]  ;;  %v507_v33 = vld [vmem:[%s1366_s5 + $0x50] sm:$0xff]  ;;  %p1040_p0 = scmp.ne.s32.totalorder %s763_s24, %s1039_s25  ;;  %p1044_p1 = scmp.lt.s32.totalorder %s763_s24, %s763_s24 }
  0x15   :  { %904 = vmatmul.mubr.msk.f32.gmra.mxu0 %vm70_vm0, %v62_v24  ;;  %933 = vmatprep.mubr.msk.f32.mxu1 %vm264_vm1, %v42_v25  ;;  %v45_v34 = vld [vmem:[%s1361_s0 + $0x58] sm:$0xff]  ;;  %v66_v35 = vld [vmem:[%s1362_s1 + $0x68] sm:$0xff]  ;;  %v46_v36 = vld [vmem:[%s1361_s0 + $0x60] sm:$0xff]  ;;  %p1045_p2 = scmp.lt.s32.totalorder %s1043_s2, %s1039_s25 }
  0x16   :  { %906 = vmatprep.mubr.msk.f32.mxu0 %vm70_vm0, %v63_v26  ;;  %951 = vmatprep.subr.mxu0 %v509_v27  ;;  %v67_v37 = vld [vmem:[%s1362_s1 + $0x70] sm:$0xff]  ;;  %v506_v38 = vld [vmem:[%s1366_s5 + $0x48] sm:$0xff]  ;;  %v505_v40 = vld [vmem:[%s1366_s5 + $0x40] sm:$0xff] }
  0x17   :  { %952 = vmatpush3.msra.mxu0 %v509_v27  ;;  %v47_v39 = vld [vmem:[%s1361_s0 + $0x68] sm:$0xff]  ;;  %v68_v41 = vld [vmem:[%s1362_s1 + $0x78] sm:$0xff]  ;;  %v48_v42 = vld [vmem:[%s1361_s0 + $0x70] sm:$0xff]  ;;  %p1046_p3 = por %p1045_p2, %p1044_p1 }
  0x18   :  { %934 = vmatmul.mubr.msk.f32.gmra.mxu1 %vm264_vm1, %v43_v28  ;;  %953 = vmatprep.subr.mxu0 %v508_v29  ;;  %v504_v43 = vld [vmem:[%s1366_s5 + $0x38] sm:$0xff]  ;;  %v503_v45 = vld [vmem:[%s1366_s5 + $0x30] sm:$0xff]  ;;  %v502_v46 = vld [vmem:[%s1366_s5 + $0x28] sm:$0xff] }
  0x19   :  { %907 = vmatmul.mubr.msk.f32.gmra.mxu0 %vm70_vm0, %v64_v30  ;;  %936 = vmatprep.mubr.msk.f32.mxu1 %vm264_vm1, %v44_v31  ;;  %v49_v44 = vld [vmem:[%s1361_s0 + $0x78] sm:$0xff]  ;;  %v501_v47 = vld [vmem:[%s1366_s5 + $0x20] sm:$0xff]  ;;  %v499_v49 = vld [vmem:[%s1366_s5 + $0x10] sm:$0xff]  ;;  %p1047_p4 = pnand %p1046_p3, %p1040_p0 }
  0x1a   :  { %909 = vmatprep.mubr.msk.f32.mxu0 %vm70_vm0, %v65_v32  ;;  %954 = vmatpush3.msra.mxu0 %v508_v29  ;;  %v500_v48 = vld [vmem:[%s1366_s5 + $0x18] sm:$0xff]  ;;  %v498_v50 = vld [vmem:[%s1366_s5 + $0x8] sm:$0xff]  ;;  %v497_v51 = vld [vmem:[%s1366_s5] sm:$0xff] }
  0x1b   :  { %955 = vmatprep.subr.mxu0 %v507_v33  ;;  %v1305_v56 = vld [vmem:[%s1365_s4] ss:$0 sm:$0xff] }
  0x1c   :  { %937 = vmatmul.mubr.msk.f32.gmra.mxu1 %vm264_vm1, %v45_v34  ;;  %956 = vmatpush3.msra.mxu0 %v507_v33 }
  0x1d   :  { %910 = vmatmul.mubr.msk.f32.gmra.mxu0 %vm70_vm0, %v66_v35  ;;  %939 = vmatprep.mubr.msk.f32.mxu1 %vm264_vm1, %v46_v36 }
  0x1e   :  { %912 = vmatprep.mubr.msk.f32.mxu0 %vm70_vm0, %v67_v37  ;;  %957 = vmatprep.subr.mxu0 %v506_v38 }
  0x1f   :  { %958 = vmatpush3.msra.mxu0 %v506_v38 }
  0x20   :  { %940 = vmatmul.mubr.msk.f32.gmra.mxu1 %vm264_vm1, %v47_v39  ;;  %959 = vmatprep.subr.mxu0 %v505_v40 }
  0x21   :  { %913 = vmatmul.mubr.msk.f32.gmra.mxu0 %vm70_vm0, %v68_v41  ;;  %942 = vmatprep.mubr.msk.f32.mxu1 %vm264_vm1, %v48_v42 }
  0x22   :  { %960 = vmatpush3.msra.mxu0 %v505_v40 }
  0x23   :  { %961 = vmatprep.subr.mxu0 %v504_v43 }
  0x24   :  { %943 = vmatmul.mubr.msk.f32.gmra.mxu1 %vm264_vm1, %v49_v44  ;;  %962 = vmatpush3.msra.mxu0 %v504_v43 }
  0x25   :  { %963 = vmatprep.subr.mxu0 %v503_v45 }
  0x26   :  { %964 = vmatpush3.msra.mxu0 %v503_v45 }
  0x27   :  { %965 = vmatprep.subr.mxu0 %v502_v46 }
  0x28   :  { %966 = vmatpush3.msra.mxu0 %v502_v46 }
  0x29   :  { %967 = vmatprep.subr.mxu0 %v501_v47 }
  0x2a   :  { %968 = vmatpush3.msra.mxu0 %v501_v47 }
  0x2b   :  { %969 = vmatprep.subr.mxu0 %v500_v48 }
  0x2c   :  { %970 = vmatpush3.msra.mxu0 %v500_v48 }
  0x2d   :  { %971 = vmatprep.subr.mxu0 %v499_v49 }
  0x2e   :  { %972 = vmatpush3.msra.mxu0 %v499_v49 }
  0x2f   :  { %973 = vmatprep.subr.mxu0 %v498_v50 }
  0x30   :  { %974 = vmatpush3.msra.mxu0 %v498_v50 }
  0x31   :  { %975 = vmatprep.subr.mxu0 %v497_v51 }
  0x32   :  { %976 = vmatpush3.msra.mxu0 %v497_v51 }
  0xc5   :  { %v893_v52 = vpop.f32.mrf.mxu0 }
  0xc7   :  { %v185_v53 = vpop.f32.mrf.mxu0 }
  0xc8   :  { %v923_v54 = vpop.f32.mrf.mxu1 }
  0xc9   :  { %v385_v55 = vadd.f32 %v923_v54, %v893_v52  ;;  %v896_v57 = vpop.f32.mrf.mxu0 }
  0xca   :  { %v379_v58 = vpop.f32.mrf.mxu1 }
  0xcb   :  { %v380_v59 = vadd.f32 %v379_v58, %v185_v53  ;;  %v195_v60 = vpop.f32.mrf.mxu0  ;;  %v466_v61 = vadd.f32 %v1305_v56, %v385_v55 }
  0xcc   :  { %v926_v62 = vpop.f32.mrf.mxu1 }
  0xcd   :  { %v465_v63 = vadd.f32 %v1305_v56, %v380_v59  ;;  %v395_v0 = vadd.f32 %v926_v62, %v896_v57  ;;  %v899_v1 = vpop.f32.mrf.mxu0  ;;  %v482_v6 = vmax.f32 %v466_v61, 0.0 }
  0xce   :  { %v389_v2 = vpop.f32.mrf.mxu1 }
  0xcf   :  { %v481_v3 = vmax.f32 %v465_v63, 0.0  ;;  %v390_v4 = vadd.f32 %v389_v2, %v195_v60  ;;  %v205_v5 = vpop.f32.mrf.mxu0  ;;  %v468_v7 = vadd.f32 %v1305_v56, %v395_v0 }
  0xd0   :  { %v929_v8 = vpop.f32.mrf.mxu1 }
  0xd1   :  { %v467_v9 = vadd.f32 %v1305_v56, %v390_v4  ;;  %v405_v10 = vadd.f32 %v929_v8, %v899_v1  ;;  %977 = vmatprep.mubr.f32.mxu0 %v481_v3  ;;  %v902_v11 = vpop.f32.mrf.mxu0  ;;  %v484_v16 = vmax.f32 %v468_v7, 0.0 }
  0xd2   :  { %v399_v12 = vpop.f32.mrf.mxu1  ;;  %978 = vmatmul.mubr.f32.vlgmr.msra.gmra.mxu0 %v482_v6  ;;  %v1061_v6 = vmov 0.0  }
  0xd3   :  { %v483_v13 = vmax.f32 %v467_v9, 0.0  ;;  %v400_v14 = vadd.f32 %v399_v12, %v205_v5  ;;  %v215_v15 = vpop.f32.mrf.mxu0  ;;  %v470_v17 = vadd.f32 %v1305_v56, %v405_v10  ;;  %1001 = vmatprep.subr.mxu1 %v1061_v6  ;;  %1033 = vmatprep.mubr.msk.f32.mxu1 %vm1062_vm2, %v1061_v6 }
  0xd4   :  { %v932_v18 = vpop.f32.mrf.mxu1 }
  0xd5   :  { %v469_v19 = vadd.f32 %v1305_v56, %v400_v14  ;;  %v415_v20 = vadd.f32 %v932_v18, %v902_v11  ;;  %980 = vmatprep.mubr.f32.mxu0 %v483_v13  ;;  %v905_v21 = vpop.f32.mrf.mxu0  ;;  %v486_v26 = vmax.f32 %v470_v17, 0.0 }
  0xd6   :  { %v409_v22 = vpop.f32.mrf.mxu1  ;;  %981 = vmatmul.mubr.f32.gmra.mxu0 %v484_v16 }
  0xd7   :  { %v485_v23 = vmax.f32 %v469_v19, 0.0  ;;  %v410_v24 = vadd.f32 %v409_v22, %v215_v15  ;;  %v225_v25 = vpop.f32.mrf.mxu0  ;;  %v472_v27 = vadd.f32 %v1305_v56, %v415_v20  ;;  %v803_v20 = vld [vmem:[%s1367_s6] ss:$0 sm:$0xff] }
  0xd8   :  { %v935_v28 = vpop.f32.mrf.mxu1 }
  0xd9   :  { %v471_v29 = vadd.f32 %v1305_v56, %v410_v24  ;;  %v425_v30 = vadd.f32 %v935_v28, %v905_v21  ;;  %983 = vmatprep.mubr.f32.mxu0 %v485_v23  ;;  %v908_v31 = vpop.f32.mrf.mxu0  ;;  %v488_v36 = vmax.f32 %v472_v27, 0.0 }
  0xda   :  { %v419_v32 = vpop.f32.mrf.mxu1  ;;  %984 = vmatmul.mubr.f32.gmra.mxu0 %v486_v26 }
  0xdb   :  { %v487_v33 = vmax.f32 %v471_v29, 0.0  ;;  %v420_v34 = vadd.f32 %v419_v32, %v225_v25  ;;  %v235_v35 = vpop.f32.mrf.mxu0  ;;  %v474_v37 = vadd.f32 %v1305_v56, %v425_v30 }
  0xdc   :  { %v938_v38 = vpop.f32.mrf.mxu1 }
  0xdd   :  { %v473_v39 = vadd.f32 %v1305_v56, %v420_v34  ;;  %v435_v40 = vadd.f32 %v938_v38, %v908_v31  ;;  %986 = vmatprep.mubr.f32.mxu0 %v487_v33  ;;  %v911_v41 = vpop.f32.mrf.mxu0  ;;  %v490_v46 = vmax.f32 %v474_v37, 0.0 }
  0xde   :  { %v429_v42 = vpop.f32.mrf.mxu1  ;;  %987 = vmatmul.mubr.f32.gmra.mxu0 %v488_v36 }
  0xdf   :  { %v489_v43 = vmax.f32 %v473_v39, 0.0  ;;  %v430_v44 = vadd.f32 %v429_v42, %v235_v35  ;;  %v245_v45 = vpop.f32.mrf.mxu0  ;;  %v476_v47 = vadd.f32 %v1305_v56, %v435_v40 }
  0xe0   :  { %v941_v48 = vpop.f32.mrf.mxu1 }
  0xe1   :  { %v475_v49 = vadd.f32 %v1305_v56, %v430_v44  ;;  %v445_v50 = vadd.f32 %v941_v48, %v911_v41  ;;  %989 = vmatprep.mubr.f32.mxu0 %v489_v43  ;;  %v914_v51 = vpop.f32.mrf.mxu0  ;;  %v492_v55 = vmax.f32 %v476_v47, 0.0 }
  0xe2   :  { %v439_v52 = vpop.f32.mrf.mxu1  ;;  %990 = vmatmul.mubr.f32.gmra.mxu0 %v490_v46 }
  0xe3   :  { %v491_v53 = vmax.f32 %v475_v49, 0.0  ;;  %v440_v54 = vadd.f32 %v439_v52, %v245_v45  ;;  %v478_v57 = vadd.f32 %v1305_v56, %v445_v50  ;;  %v255_v61 = vpop.f32.mrf.mxu0 }
  0xe4   :  { %v944_v58 = vpop.f32.mrf.mxu1 }
  0xe5   :  { %v477_v59 = vadd.f32 %v1305_v56, %v440_v54  ;;  %v455_v60 = vadd.f32 %v944_v58, %v914_v51  ;;  %992 = vmatprep.mubr.f32.mxu0 %v491_v53  ;;  %v494_v1 = vmax.f32 %v478_v57, 0.0  ;;  %v753_v57 = vstv %s1369_s8 }
  0xe6   :  { %v449_v62 = vpop.f32.mrf.mxu1  ;;  %993 = vmatmul.mubr.f32.gmra.mxu0 %v492_v55  ;;  %v681_v55 = vld [vmem:[%s1368_s7] sm:$0xff] }
  0xe7   :  { %v493_v63 = vmax.f32 %v477_v59, 0.0  ;;  %v450_v0 = vadd.f32 %v449_v62, %v255_v61  ;;  %v480_v2 = vadd.f32 %v1305_v56, %v455_v60 }
  0xe9   :  { %v479_v3 = vadd.f32 %v1305_v56, %v450_v0  ;;  %995 = vmatprep.mubr.f32.mxu0 %v493_v63  ;;  %v496_v5 = vmax.f32 %v480_v2, 0.0 }
  0xea   :  { %996 = vmatmul.mubr.f32.gmra.mxu0 %v494_v1 }
  0xeb   :  { %v495_v4 = vmax.f32 %v479_v3, 0.0 }
  0xed   :  { %998 = vmatprep.mubr.f32.mxu0 %v495_v4 }
  0xee   :  { %999 = vmatmul.mubr.f32.gmra.mxu0 %v496_v5 }
 0x192   :  { %v1325_v7 = vpop.f32.mrf.mxu0 }
 0x193   :  { %v592_v50 = vadd.f32 %v1325_v7, %v803_v20 }
 0x194   :  { %v1327_v8 = vpop.f32.mrf.mxu0 }
 0x195   :  { %v666_v52 = vmax.f32 %v592_v50, 0.0  ;;  %v587_v53 = vadd.f32 %v803_v20, %v1327_v8 }
 0x196   :  { %v982_v9 = vpop.f32.mrf.mxu0 }
 0x197   :  { %v602_v46 = vadd.f32 %v982_v9, %v803_v20  ;;  %v665_v54 = vmax.f32 %v587_v53, 0.0 }
 0x198   :  { %v1329_v10 = vpop.f32.mrf.mxu0 }
 0x199   :  { %v668_v48 = vmax.f32 %v602_v46, 0.0  ;;  %v597_v49 = vadd.f32 %v803_v20, %v1329_v10 }
 0x19a   :  { %v985_v56 = vpop.f32.mrf.mxu0 }
 0x19b   :  { %v612_v42 = vadd.f32 %v985_v56, %v803_v20  ;;  %v667_v51 = vmax.f32 %v597_v49, 0.0 }
 0x19c   :  { %v606_v11 = vpop.f32.mrf.mxu0 }
 0x19d   :  { %v670_v44 = vmax.f32 %v612_v42, 0.0  ;;  %v607_v45 = vadd.f32 %v803_v20, %v606_v11 }
 0x19e   :  { %v988_v12 = vpop.f32.mrf.mxu0 }
 0x19f   :  { %v622_v38 = vadd.f32 %v988_v12, %v803_v20  ;;  %v669_v47 = vmax.f32 %v607_v45, 0.0 }
 0x1a0   :  { %v616_v13 = vpop.f32.mrf.mxu0 }
 0x1a1   :  { %v672_v40 = vmax.f32 %v622_v38, 0.0  ;;  %v617_v41 = vadd.f32 %v803_v20, %v616_v13 }
 0x1a2   :  { %v991_v14 = vpop.f32.mrf.mxu0 }
 0x1a3   :  { %v632_v34 = vadd.f32 %v991_v14, %v803_v20  ;;  %v671_v43 = vmax.f32 %v617_v41, 0.0 }
 0x1a4   :  { %v626_v15 = vpop.f32.mrf.mxu0 }
 0x1a5   :  { %v674_v36 = vmax.f32 %v632_v34, 0.0  ;;  %v627_v37 = vadd.f32 %v803_v20, %v626_v15 }
 0x1a6   :  { %v994_v16 = vpop.f32.mrf.mxu0 }
 0x1a7   :  { %v642_v30 = vadd.f32 %v994_v16, %v803_v20  ;;  %v673_v39 = vmax.f32 %v627_v37, 0.0 }
 0x1a8   :  { %v636_v17 = vpop.f32.mrf.mxu0 }
 0x1a9   :  { %v676_v32 = vmax.f32 %v642_v30, 0.0  ;;  %v637_v33 = vadd.f32 %v803_v20, %v636_v17 }
 0x1aa   :  { %v997_v18 = vpop.f32.mrf.mxu0 }
 0x1ab   :  { %v652_v26 = vadd.f32 %v997_v18, %v803_v20  ;;  %v675_v35 = vmax.f32 %v637_v33, 0.0 }
 0x1ac   :  { %v646_v19 = vpop.f32.mrf.mxu0 }
 0x1ad   :  { %v678_v28 = vmax.f32 %v652_v26, 0.0  ;;  %v647_v29 = vadd.f32 %v803_v20, %v646_v19 }
 0x1ae   :  { %v1000_v21 = vpop.f32.mrf.mxu0 }
 0x1af   :  { %v662_v22 = vadd.f32 %v1000_v21, %v803_v20  ;;  %v677_v31 = vmax.f32 %v647_v29, 0.0 }
 0x1b0   :  { %v656_v23 = vpop.f32.mrf.mxu0 }
 0x1b1   :  { %v680_v24 = vmax.f32 %v662_v22, 0.0  ;;  %v657_v25 = vadd.f32 %v803_v20, %v656_v23 }
 0x1b3   :  { %1002 = vmatpush3.xpose.msra.mxu1 %v680_v24  ;;  %v679_v27 = vmax.f32 %v657_v25, 0.0 }
 0x1b4   :  { %1003 = vmatprep.subr.mxu1 %v1061_v6 }
 0x1b7   :  { %1004 = vmatpush3.xpose.msra.mxu1 %v679_v27 }
 0x1b8   :  { %1005 = vmatprep.subr.mxu1 %v1061_v6 }
 0x1bb   :  { %1006 = vmatpush3.xpose.msra.mxu1 %v678_v28 }
 0x1bc   :  { %1007 = vmatprep.subr.mxu1 %v1061_v6 }
 0x1bf   :  { %1008 = vmatpush3.xpose.msra.mxu1 %v677_v31 }
 0x1c0   :  { %1009 = vmatprep.subr.mxu1 %v1061_v6 }
 0x1c3   :  { %1010 = vmatpush3.xpose.msra.mxu1 %v676_v32 }
 0x1c4   :  { %1011 = vmatprep.subr.mxu1 %v1061_v6 }
 0x1c7   :  { %1012 = vmatpush3.xpose.msra.mxu1 %v675_v35 }
 0x1c8   :  { %1013 = vmatprep.subr.mxu1 %v1061_v6 }
 0x1cb   :  { %1014 = vmatpush3.xpose.msra.mxu1 %v674_v36 }
 0x1cc   :  { %1015 = vmatprep.subr.mxu1 %v1061_v6 }
 0x1cf   :  { %1016 = vmatpush3.xpose.msra.mxu1 %v673_v39 }
 0x1d0   :  { %1017 = vmatprep.subr.mxu1 %v1061_v6 }
 0x1d3   :  { %1018 = vmatpush3.xpose.msra.mxu1 %v672_v40 }
 0x1d4   :  { %1019 = vmatprep.subr.mxu1 %v1061_v6 }
 0x1d7   :  { %1020 = vmatpush3.xpose.msra.mxu1 %v671_v43 }
 0x1d8   :  { %1021 = vmatprep.subr.mxu1 %v1061_v6 }
 0x1db   :  { %1022 = vmatpush3.xpose.msra.mxu1 %v670_v44 }
 0x1dc   :  { %1023 = vmatprep.subr.mxu1 %v1061_v6 }
 0x1df   :  { %1024 = vmatpush3.xpose.msra.mxu1 %v669_v47 }
 0x1e0   :  { %1025 = vmatprep.subr.mxu1 %v1061_v6 }
 0x1e3   :  { %1026 = vmatpush3.xpose.msra.mxu1 %v668_v48 }
 0x1e4   :  { %1027 = vmatprep.subr.mxu1 %v1061_v6 }
 0x1e7   :  { %1028 = vmatpush3.xpose.msra.mxu1 %v667_v51 }
 0x1e8   :  { %1029 = vmatprep.subr.mxu1 %v1061_v6 }
 0x1eb   :  { %1030 = vmatpush3.xpose.msra.mxu1 %v666_v52 }
 0x1ec   :  { %1031 = vmatprep.subr.mxu1 %v1061_v6 }
 0x1ef   :  { %1032 = vmatpush3.xpose.msra.mxu1 %v665_v54 }
 0x1f2   :  { %1034 = vmatmul.mubr.f32.vlgmr.msra.gmra.mxu1 %v681_v55 }
 0x2b2   :  { %v748_v58 = vpop.f32.mrf.mxu1 }
 0x2b3   :  { %v754_v59 = vadd.f32 %v753_v57, %v748_v58 }
 0x2b4   :  { %v1035_v60 = vpop.f32.mrf.mxu1 }
 0x2b5   :  { %755 = vst [vmem:[#allocation3] sm:$0x1] %v754_v59 }
 0x2b6   :  { %1050 = shalt.err (!%p1047_p4)
}
 0x2b7   :  { %765 = dma.vmem_to_hbm [thread:$0]  %s763_s24, 16, %s1370_s9, [#allocation4]  }
 0x2b8   :  { %1059 = dma.done.wait [#allocation4], 16  }
 0x2b9   :  { %1060 = vsyncadd [#allocation4], 4294967280 }
 0x2ba   :  { %769 = vsyncpa [#allocation4], 1 }

</bundles_post_ra>
